<compile_context>
chip_gen: v6e
topology: v6e:2x2x1
jax: 0.10.0
libtpu: 0.0.40
codegen_flags: <defaults>
</compile_context>

<pallas_src>
import functools

import jax
import jax.numpy as jnp
from jax.experimental import pallas as pl
from jax.experimental.pallas import tpu as pltpu

_LANES = 128
_SUBLANES = 8
_MAX_WIDTH = 16384  # widest lane-dense row we consider (elements)


# ---------------------------------------------------------------------------
# Kernel
# ---------------------------------------------------------------------------
def _scale_kernel(scale_ref, x_ref, o_ref, *, native_mul):
    s = scale_ref[0]  # fp32 scalar living in SMEM
    if native_mul:
        # in/out dtypes match -> multiply natively (halves vreg/cast work for
        # packed bf16); numerically identical for f32.
        o_ref[...] = x_ref[...] * s.astype(o_ref.dtype)
    else:
        # mixed dtypes (or v5e, no bf16 VALU): compute in f32, cast once.
        o_ref[...] = (x_ref[...].astype(jnp.float32) * s).astype(o_ref.dtype)


# ---------------------------------------------------------------------------
# Hardware-aware planning
# ---------------------------------------------------------------------------
def _hw_plan():
    """Returns (vmem_limit_bytes, double_buffered in+out budget bytes)."""
    vmem_cap = None
    try:
        vmem_cap = getattr(pltpu.get_tpu_info(), "vmem_capacity_bytes", None)
    except Exception:
        vmem_cap = None
    if vmem_cap is not None and vmem_cap >= 100 * (1 << 20):
        # v5e / v6e: 128 MiB physical VMEM -> raise scoped limit, big blocks.
        return 64 << 20, 48 << 20
    # v7x (64 MiB physical VMEM per TC) or unknown: conservative, safe everywhere.
    return 48 << 20, 32 << 20


def _device_kind():
    try:
        return jax.devices()[0].device_kind.lower()
    except Exception:
        return ""


def _round_up(x, m):
    return pl.cdiv(x, m) * m


# ---------------------------------------------------------------------------
# Wrapper
# ---------------------------------------------------------------------------
def scale_forward(x, scale):
    """y = x * scale (scalar). x: any shape; scale: shape-(1,) array."""
    orig_shape = x.shape
    in_dtype = x.dtype
    out_dtype = jnp.promote_types(in_dtype, scale.dtype)
    total = x.size

    if total == 0:
        return jnp.zeros(orig_shape, out_dtype)

    in_isz = jnp.dtype(in_dtype).itemsize
    out_isz = jnp.dtype(out_dtype).itemsize

    vmem_limit, db_budget = _hw_plan()
    per_block_bytes = db_budget // 2  # one grid step's in + out tiles

    kind = _device_kind()
    native_mul = (in_dtype == out_dtype) and ("v5e" not in kind) and ("v5 lite" not in kind)
    kernel = functools.partial(_scale_kernel, native_mul=native_mul)

    compiler_params = pltpu.CompilerParams(
        dimension_semantics=("parallel",),  # shards grid steps across TCs (v7x)
        vmem_limit_bytes=vmem_limit,
    )
    cost = pl.CostEstimate(
        flops=total,
        transcendentals=0,
        bytes_accessed=total * (in_isz + out_isz),
    )
    scale_f32 = scale.astype(jnp.float32).reshape((1,))
    x_flat = x.reshape(-1)

    if total % _LANES == 0:
        # ---- lane-dense 2-D slab (the common case; reshape is free) ----
        width = _LANES
        for d in range(_MAX_WIDTH // _LANES, 0, -1):  # any multiple-of-128 divisor
            if total % (_LANES * d) == 0:
                width = _LANES * d
                break
        rows = total // width

        # Size block from the combined in+out footprint (double-buffered).
        block_rows = per_block_bytes // (width * (in_isz + out_isz))
        block_rows = max(_SUBLANES, (block_rows // _SUBLANES) * _SUBLANES)
        if block_rows >= rows:
            if rows >= 2 * _SUBLANES and total * in_isz > (1 << 20):
                # Keep >= 2 grid steps so both v7x TensorCores stream.
                block_rows = _round_up(pl.cdiv(rows, 2), _SUBLANES)
            else:
                block_rows = rows  # single full-extent block (tiny tensors)
        grid = (pl.cdiv(rows, block_rows),)

        x2d = x_flat.reshape(rows, width)
        out = pl.pallas_call(
            kernel,
            out_shape=jax.ShapeDtypeStruct((rows, width), out_dtype),
            grid_spec=pltpu.PrefetchScalarGridSpec(
                num_scalar_prefetch=0,
                grid=grid,
                in_specs=[
                    pl.BlockSpec(memory_space=pltpu.SMEM),                # scale
                    pl.BlockSpec((block_rows, width), lambda i: (i, 0)),  # x tile
                ],
                out_specs=pl.BlockSpec((block_rows, width), lambda i: (i, 0)),
            ),
            compiler_params=compiler_params,
            cost_estimate=cost,
        )(scale_f32, x2d)
        return out.reshape(orig_shape)

    # ---- ragged size (total not a multiple of 128) ----
    # Handle the remainder inside the pallas_call with a partial last lane
    # block on a (1, total) view: no jnp.pad and no output slice, so no extra
    # full-tensor HBM passes in the wrapper.
    if total <= _LANES:
        block_w = total  # single full-extent block
    else:
        # Assume worst-case sublane padding (8x) for the (1, W) VMEM tiles.
        budget_elems = per_block_bytes // ((in_isz + out_isz) * _SUBLANES)
        block_w = max(_LANES, (budget_elems // _LANES) * _LANES)
        block_w = min(block_w, (total // _LANES) * _LANES)
    grid = (pl.cdiv(total, block_w),)

    x2d = x_flat.reshape(1, total)
    out = pl.pallas_call(
        kernel,
        out_shape=jax.ShapeDtypeStruct((1, total), out_dtype),
        grid_spec=pltpu.PrefetchScalarGridSpec(
            num_scalar_prefetch=0,
            grid=grid,
            in_specs=[
                pl.BlockSpec(memory_space=pltpu.SMEM),           # scale
                pl.BlockSpec((1, block_w), lambda i: (0, i)),    # x lane tile
            ],
            out_specs=pl.BlockSpec((1, block_w), lambda i: (0, i)),
        ),
        compiler_params=compiler_params,
        cost_estimate=cost,
    )(scale_f32, x2d)
    return out.reshape(orig_shape)


class Scale:
    """JAX/Pallas port of the PyTorch Scale module."""

    def __init__(self, init_value=1.0, dtype=jnp.float32):
        # matches nn.Parameter(torch.tensor([init_value], dtype=dtype))
        self.scale = jnp.array([init_value], dtype=dtype)

    def __call__(self, x):
        return scale_forward(x, self.scale)


if __name__ == "__main__":
    key = jax.random.PRNGKey(0)
    k1, k2, k3 = jax.random.split(key, 3)

    module = Scale(init_value=1.5)

    # 1) NCHW feature map (same convention as the PyTorch FCOS head).
    x = jax.random.normal(k1, (2, 4, 16, 16), dtype=jnp.float32)
    y = jax.block_until_ready(module(x))
    ref = x * module.scale
    assert y.shape == x.shape and y.dtype == ref.dtype
    assert jnp.allclose(y, ref, atol=1e-6, rtol=1e-6)

    # 2) Ragged element count (not a multiple of 128) -> in-kernel partial
    #    edge block, no wrapper pad/slice.
    xr = jax.random.normal(k2, (5, 9, 61), dtype=jnp.float32)
    yr = jax.block_until_ready(module(xr))
    refr = xr * module.scale
    assert yr.shape == xr.shape and yr.dtype == refr.dtype
    assert jnp.allclose(yr, refr, atol=1e-6, rtol=1e-6)

    # 3) Mixed dtype (bf16 x, fp32 scale) -> promoted f32 output, block sizing
    #    accounts for the wider output tiles.
    xb = jax.random.normal(k3, (2, 4, 16, 16), dtype=jnp.bfloat16)
    yb = jax.block_until_ready(module(xb))
    refb = xb * module.scale
    assert yb.shape == xb.shape and yb.dtype == refb.dtype
    assert jnp.allclose(yb, refb, atol=1e-2, rtol=1e-2)

    print("KERNEL_OK")
</pallas_src>

<mosaic_0001>
module attributes {stable_mosaic.version = 11 : i64} {
  func.func @_scale_kernel(%arg0: i32, %arg1: memref<1xf32, #tpu.memory_space<smem>>, %arg2: memref<1x2048xf32, #tpu.memory_space<vmem>>, %arg3: memref<1x2048xf32, #tpu.memory_space<vmem>>) attributes {dimension_semantics = [#tpu.dimension_semantics<parallel>], iteration_bounds = array<i64: 1>, scalar_prefetch = 0 : i64, scratch_operands = 0 : i64, tpu.core_type = #tpu.core_type<tc>, window_params = [{transform_indices = @transform_0, window_bounds = array<i64: 1>}, {transform_indices = @transform_1, window_bounds = array<i64: 1, 2048>}, {transform_indices = @transform_2, window_bounds = array<i64: 1, 2048>}]} {
    %c0 = arith.constant 0 : index
    %0 = memref.load %arg1[%c0] : memref<1xf32, #tpu.memory_space<smem>>
    %c0_0 = arith.constant 0 : index
    %c0_1 = arith.constant 0 : index
    %1 = vector.load %arg2[%c0_0, %c0_1] : memref<1x2048xf32, #tpu.memory_space<vmem>>, vector<1x2048xf32>
    %2 = vector.broadcast %0 : f32 to vector<1x2048xf32>
    %3 = arith.mulf %1, %2 : vector<1x2048xf32>
    %c0_2 = arith.constant 0 : index
    %c0_3 = arith.constant 0 : index
    %4 = vector.load %arg3[%c0_2, %c0_3] : memref<1x2048xf32, #tpu.memory_space<vmem>>, vector<1x2048xf32>
    tpu.vector_store %arg3[%c0_2, %c0_3], %3 {strides = array<i32>} : memref<1x2048xf32, #tpu.memory_space<vmem>>, vector<1x2048xf32>,
    return
  }
  func.func @transform_0(%arg0: i32) -> i32 {
    %c0_i32 = arith.constant 0 : i32
    %c0_i32_0 = arith.constant 0 : i32
    return %c0_i32 : i32
  }
  func.func @transform_1(%arg0: i32) -> (i32, i32) {
    %c0_i32 = arith.constant 0 : i32
    %c0_i32_0 = arith.constant 0 : i32
    return %arg0, %c0_i32 : i32, i32
  }
  func.func @transform_2(%arg0: i32) -> (i32, i32) {
    %c0_i32 = arith.constant 0 : i32
    %c0_i32_0 = arith.constant 0 : i32
    return %arg0, %c0_i32 : i32, i32
  }
}

</mosaic_0001>

<bundles_post_ra>
// kernel: tpu_custom_call.1
= control target key start
LH: loop header
LB: loop body
LE: loop exit
PB: predicated region body
PF: predicated region fallthrough
CT: control target
= control target key end

     0   :  { %8 = vsyncpa [#allocation4], 0  ;;  %s120_s0 = inlined_call_operand.<no memory space> [shape: f32[1], index: 0, kind: input, shape index: {}]   ;;  %s121_s1 = inlined_call_operand.hbm [shape: f32[1,2048], index: 1, kind: input, shape index: {}]   ;;  %s122_s2 = inlined_call_operand.hbm [shape: f32[1,2048], index: 2, kind: output, shape index: {}]  }
   0x1   :  { %9 = vsyncpa [#allocation5], 0  ;;  %s94_s9 = smov [#allocation3]  }
   0x2   :  { %s18_s10 = sshll.u32 %s94_s9, 4  ;;  %s19_s10 = int_to_ptr.vmem [resolvable:$true] %s18_s10 }
   0x3   :  { %s58_s11 = scalar_lea.vmem %s19_s10, 256  ;;  %p63_p1 = scmp.lt.s32.totalorder %s19_s10, %s19_s10 }
   0x4   :  { %p59_p0 = scmp.ne.s32.totalorder %s19_s10, %s58_s11  ;;  %p64_p2 = scmp.lt.s32.totalorder %s58_s11, %s58_s11 }
   0x6   :  { %p65_p3 = por %p64_p2, %p63_p1 }
   0x8   :  { %p66_p4 = pnand %p65_p3, %p59_p0 }
   0xa   :  { %69 = shalt.err (!%p66_p4)
}
   0xb   :  { %21 = dma.hbm_to_vmem [thread:$0]  %s121_s1, 256, %s19_s10, [#allocation4]  }
   0xc   :  { %90 = dma.done.wait [#allocation4], 256  }
   0xd   :  { %91 = vsyncadd [#allocation4], 4294967040  ;;  %v28_v0 = vstv %s120_s0  ;;  %s95_s16 = smov [#allocation6]   ;;  %v26_v1 = vld [vmem:[#allocation3] sm:$0xff]  ;;  %v27_v2 = vld [vmem:[#allocation3 + $0x8] sm:$0xff] }
   0xe   :  { %s39_s17 = sshll.u32 %s95_s16, 4  ;;  %v29_v3 = vmul.f32 %v28_v0, %v26_v1  ;;  %v30_v4 = vmul.f32 %v28_v0, %v27_v2  ;;  %s40_s17 = int_to_ptr.vmem [resolvable:$true] %s39_s17 }
   0xf   :  { %s70_s18 = scalar_lea.vmem %s40_s17, 256  ;;  %p75_p6 = scmp.lt.s32.totalorder %s40_s17, %s40_s17 }
  0x10   :  { %31 = vst [vmem:[#allocation6] sm:$0xff] %v29_v3  ;;  %32 = vst [vmem:[#allocation6 + $0x8] sm:$0xff] %v30_v4  ;;  %p71_p5 = scmp.ne.s32.totalorder %s40_s17, %s70_s18  ;;  %p76_p7 = scmp.lt.s32.totalorder %s70_s18, %s70_s18 }
  0x12   :  { %p77_p8 = por %p76_p7, %p75_p6 }
  0x14   :  { %p78_p9 = pnand %p77_p8, %p71_p5 }
  0x16   :  { %81 = shalt.err (!%p78_p9)
}
  0x17   :  { %42 = dma.vmem_to_hbm [thread:$0]  %s40_s17, 256, %s122_s2, [#allocation5]  }
  0x18   :  { %92 = dma.done.wait [#allocation5], 256  }
  0x19   :  { %93 = vsyncadd [#allocation5], 4294967040 }
  0x1a   :  { %46 = vsyncpa [#allocation4], 1 }
  0x1b   :  { %47 = vsyncpa [#allocation5], 1 }

</bundles_post_ra>
